<compile_context>
chip_gen: v6e
topology: v6e:2x2x1
jax: 0.10.0
libtpu: 0.0.40
codegen_flags: <defaults>
</compile_context>

<pallas_src>
import functools

import jax
import jax.numpy as jnp
from jax.experimental import pallas as pl
from jax.experimental.pallas import tpu as pltpu


# ---------------------------------------------------------------------------
# Fused CAB kernel: one grid step per batch element, everything in VMEM.
# Layout inside the kernel: activations are (C, H*W) with H*W on lanes.
# ---------------------------------------------------------------------------
def _cab_kernel(x_ref, w1_ref, b1_ref, w2_ref, b2_ref,
                caw1_ref, caw2_ref, wt_ref, bt_ref,
                o_ref,
                xpad_ref, col_ref,
                *, H, W, C, PAD):
    HW = H * W
    f32 = jnp.float32

    # Column-validity masks for horizontally shifted taps (depend only on the
    # lane position; computed once, reused by both 3x3 convs).
    lane_x = jax.lax.broadcasted_iota(jnp.int32, (1, HW), 1) % W
    mask_l = lane_x >= 1            # dx = -1 tap valid
    mask_r = lane_x <= W - 2        # dx = +1 tap valid

    # Flat zero-padded staging buffer: the image lives in [PAD, PAD + HW), so
    # the (dy, dx) tap is the static window starting at PAD + dy*W + dx. The
    # leading/trailing PAD zeros implement the vertical (row) halo; the masks
    # above kill the horizontal wrap-around into neighbouring rows.
    xpad_ref[...] = jnp.zeros_like(xpad_ref)

    def conv3x3(a, w_ref, b_ref, relu):
        """a: (C, HW) f32 -> (C, HW) f32. 3x3 'same' conv as one K=9C matmul."""
        xpad_ref[:, PAD:PAD + HW] = a            # lane-aligned store (PAD%128==0)
        t = 0
        for dy in (-1, 0, 1):
            for dx in (-1, 0, 1):
                off = PAD + dy * W + dx
                tap = xpad_ref[:, off:off + HW]  # static window load, (C, HW)
                if dx == -1:
                    tap = jnp.where(mask_l, tap, 0.0)
                elif dx == 1:
                    tap = jnp.where(mask_r, tap, 0.0)
                col_ref[t * C:(t + 1) * C, :] = tap   # im2col row block t
                t += 1
        acc = jnp.dot(w_ref[...], col_ref[...],       # (C, 9C) @ (9C, HW)
                      preferred_element_type=f32)
        acc = acc + b_ref[...]                        # (C, 1) broadcast
        return jnp.maximum(acc, 0.0) if relu else acc

    x = x_ref[0].astype(f32)                          # (C, HW)
    r = conv3x3(x, w1_ref, b1_ref, relu=True)         # head conv1 + ReLU
    r = conv3x3(r, w2_ref, b2_ref, relu=False)        # head conv2

    # CALayerV2: global avg pool -> 1x1 (x factor) -> ReLU -> 1x1 -> sigmoid.
    y = jnp.mean(r, axis=1, keepdims=True)                            # (C, 1)
    h = jnp.maximum(
        jnp.sum(y * caw1_ref[...], axis=0, keepdims=True), 0.0)       # (1, Cf)
    att = jax.nn.sigmoid(
        jnp.sum(h * caw2_ref[...], axis=1, keepdims=True))            # (C, 1)

    r = r * att + x                                   # channel scale + residual

    # 1x1 tail conv with bias: (Cout, C) @ (C, HW) -> lane-dense output.
    out = jnp.dot(wt_ref[...], r, preferred_element_type=f32) + bt_ref[...]
    o_ref[0] = out.astype(o_ref.dtype)


def cab_forward(x_nchw, params):
    """CAB forward. x: (N, C, H, W) -> (N, Cout, H, W)."""
    N, C, H, W = x_nchw.shape
    HW = H * W
    Cf = params["ca_w1"].shape[1]
    Cout = params["tail_w"].shape[0]
    PAD = ((W + 1 + 127) // 128) * 128       # lane-aligned halo >= W + 1

    x_flat = x_nchw.reshape(N, C, HW)        # free reshape (contiguous dims)
    # 3x3 HWIO weights -> (Cout, 9*Cin) matmul slabs matching im2col row order.
    w1 = params["head_w1"].reshape(9 * C, C).T
    w2 = params["head_w2"].reshape(9 * C, C).T
    b1 = params["head_b1"].reshape(C, 1)
    b2 = params["head_b2"].reshape(C, 1)
    bt = params["tail_b"].reshape(Cout, 1)

    kern = functools.partial(_cab_kernel, H=H, W=W, C=C, PAD=PAD)
    out = pl.pallas_call(
        kern,
        out_shape=jax.ShapeDtypeStruct((N, Cout, HW), x_nchw.dtype),
        grid=(N,),
        in_specs=[
            pl.BlockSpec((1, C, HW), lambda n: (n, 0, 0)),     # x
            pl.BlockSpec((C, 9 * C), lambda n: (0, 0)),        # head w1
            pl.BlockSpec((C, 1), lambda n: (0, 0)),            # head b1
            pl.BlockSpec((C, 9 * C), lambda n: (0, 0)),        # head w2
            pl.BlockSpec((C, 1), lambda n: (0, 0)),            # head b2
            pl.BlockSpec((C, Cf), lambda n: (0, 0)),           # CA W1^T
            pl.BlockSpec((C, Cf), lambda n: (0, 0)),           # CA W2
            pl.BlockSpec((Cout, C), lambda n: (0, 0)),         # tail w
            pl.BlockSpec((Cout, 1), lambda n: (0, 0)),         # tail b
        ],
        out_specs=pl.BlockSpec((1, Cout, HW), lambda n: (n, 0, 0)),
        scratch_shapes=[
            pltpu.VMEM((C, PAD + HW + PAD), jnp.float32),      # flat padded img
            pltpu.VMEM((9 * C, HW), jnp.float32),              # im2col slab
        ],
        compiler_params=pltpu.CompilerParams(
            dimension_semantics=("parallel",)),
    )(x_flat, w1, b1, w2, b2, params["ca_w1"], params["ca_w2"],
      params["tail_w"], bt)
    return out.reshape(N, Cout, H, W)


# ---------------------------------------------------------------------------
# Pure-JAX reference (correctness check)
# ---------------------------------------------------------------------------
def cab_reference(x_nchw, params):
    hi = jax.lax.Precision.HIGHEST

    def conv3(inp, w_hwio, b):
        o = jax.lax.conv_general_dilated(
            inp, w_hwio, (1, 1), "SAME",
            dimension_numbers=("NCHW", "HWIO", "NCHW"), precision=hi)
        return o + b[None, :, None, None]

    r = jax.nn.relu(conv3(x_nchw, params["head_w1"], params["head_b1"]))
    r = conv3(r, params["head_w2"], params["head_b2"])
    y = jnp.mean(r, axis=(2, 3))                                       # (N, C)
    h = jax.nn.relu(jnp.einsum("nc,cf->nf", y, params["ca_w1"], precision=hi))
    att = jax.nn.sigmoid(
        jnp.einsum("nf,cf->nc", h, params["ca_w2"], precision=hi))
    r = r * att[:, :, None, None] + x_nchw
    out = jnp.einsum("oc,nchw->nohw", params["tail_w"], r, precision=hi)
    return out + params["tail_b"][None, :, None, None]


def init_params(key, in_chn, out_chn, factor):
    ks = jax.random.split(key, 8)
    cf = in_chn * factor
    s = 0.1
    return {
        # head 3x3 convs stored HWIO (ky, kx, Cin, Cout), with bias
        "head_w1": s * jax.random.normal(ks[0], (3, 3, in_chn, in_chn), jnp.float32),
        "head_b1": s * jax.random.normal(ks[1], (in_chn,), jnp.float32),
        "head_w2": s * jax.random.normal(ks[2], (3, 3, in_chn, in_chn), jnp.float32),
        "head_b2": s * jax.random.normal(ks[3], (in_chn,), jnp.float32),
        # CALayerV2 1x1 convs (bias=False), stored lane-dense:
        #   ca_w1 = W1^T  (C, C*factor)   [torch W1: (Cf, C)]
        #   ca_w2 = W2    (C, C*factor)   [torch W2: (C, Cf)]
        "ca_w1": s * jax.random.normal(ks[4], (in_chn, cf), jnp.float32),
        "ca_w2": s * jax.random.normal(ks[5], (in_chn, cf), jnp.float32),
        # tail 1x1 conv with bias, stored (Cout, Cin)
        "tail_w": s * jax.random.normal(ks[6], (out_chn, in_chn), jnp.float32),
        "tail_b": s * jax.random.normal(ks[7], (out_chn,), jnp.float32),
    }


if __name__ == "__main__":
    N, C_in, C_out, H, W = 2, 4, 4, 16, 16
    factor = 128

    key = jax.random.PRNGKey(0)
    k_x, k_p = jax.random.split(key)
    x = jax.random.normal(k_x, (N, C_in, H, W), jnp.float32)
    params = init_params(k_p, C_in, C_out, factor)

    out = jax.block_until_ready(cab_forward(x, params))
    ref = jax.block_until_ready(cab_reference(x, params))

    assert out.shape == (N, C_out, H, W), out.shape
    max_err = float(jnp.max(jnp.abs(out - ref)))
    assert jnp.allclose(out, ref, atol=1e-4, rtol=1e-4), max_err
    print("KERNEL_OK")
</pallas_src>

<mosaic_0001>
module attributes {stable_mosaic.version = 11 : i64} {
  func.func @_cab_kernel(%arg0: i32, %arg1: memref<1x4x256xf32, #tpu.memory_space<vmem>>, %arg2: memref<4x36xf32, #tpu.memory_space<vmem>>, %arg3: memref<4x1xf32, #tpu.memory_space<vmem>>, %arg4: memref<4x36xf32, #tpu.memory_space<vmem>>, %arg5: memref<4x1xf32, #tpu.memory_space<vmem>>, %arg6: memref<4x512xf32, #tpu.memory_space<vmem>>, %arg7: memref<4x512xf32, #tpu.memory_space<vmem>>, %arg8: memref<4x4xf32, #tpu.memory_space<vmem>>, %arg9: memref<4x1xf32, #tpu.memory_space<vmem>>, %arg10: memref<1x4x256xf32, #tpu.memory_space<vmem>>, %arg11: memref<4x512xf32, #tpu.memory_space<vmem>>, %arg12: memref<36x256xf32, #tpu.memory_space<vmem>>) attributes {dimension_semantics = [#tpu.dimension_semantics<parallel>], iteration_bounds = array<i64: 2>, scalar_prefetch = 0 : i64, scratch_operands = 2 : i64, tpu.core_type = #tpu.core_type<tc>, window_params = [{transform_indices = @transform_0, window_bounds = array<i64: 1, 4, 256>}, {pipeline_mode = #tpu.pipeline_mode<synchronous>, transform_indices = @transform_1, window_bounds = array<i64: 4, 36>}, {pipeline_mode = #tpu.pipeline_mode<synchronous>, transform_indices = @transform_2, window_bounds = array<i64: 4, 1>}, {pipeline_mode = #tpu.pipeline_mode<synchronous>, transform_indices = @transform_3, window_bounds = array<i64: 4, 36>}, {pipeline_mode = #tpu.pipeline_mode<synchronous>, transform_indices = @transform_4, window_bounds = array<i64: 4, 1>}, {pipeline_mode = #tpu.pipeline_mode<synchronous>, transform_indices = @transform_5, window_bounds = array<i64: 4, 512>}, {pipeline_mode = #tpu.pipeline_mode<synchronous>, transform_indices = @transform_6, window_bounds = array<i64: 4, 512>}, {pipeline_mode = #tpu.pipeline_mode<synchronous>, transform_indices = @transform_7, window_bounds = array<i64: 4, 4>}, {pipeline_mode = #tpu.pipeline_mode<synchronous>, transform_indices = @transform_8, window_bounds = array<i64: 4, 1>}, {transform_indices = @transform_9, window_bounds = array<i64: 1, 4, 256>}]} {
    %0 = tpu.iota {dimensions = array<i32: 1>} : vector<1x256xi32>
    %c16_i32 = arith.constant 16 : i32
    %c0_i32 = arith.constant 0 : i32
    %1 = arith.cmpi eq, %c16_i32, %c0_i32 : i32
    %c1_i32 = arith.constant 1 : i32
    %2 = arith.select %1, %c1_i32, %c16_i32 : i32
    %3 = vector.broadcast %2 : i32 to vector<1x256xi32>
    %4 = arith.remsi %0, %3 : vector<1x256xi32>
    %c0_i32_0 = arith.constant 0 : i32
    %5 = vector.broadcast %c0_i32_0 : i32 to vector<1x256xi32>
    %6 = arith.cmpi ne, %4, %5 : vector<1x256xi32>
    %c0_i32_1 = arith.constant 0 : i32
    %7 = vector.broadcast %c0_i32_1 : i32 to vector<1x256xi32>
    %8 = arith.cmpi slt, %4, %7 : vector<1x256xi32>
    %c0_i32_2 = arith.constant 0 : i32
    %9 = arith.cmpi slt, %2, %c0_i32_2 : i32
    %10 = vector.broadcast %9 : i1 to vector<1x256xi1>
    %11 = vector.broadcast %10 : vector<1x256xi1> to vector<1x256xi1>
    %12 = arith.xori %8, %11 : vector<1x256xi1>
    %13 = arith.andi %12, %6 : vector<1x256xi1>
    %14 = vector.broadcast %2 : i32 to vector<1x256xi32>
    %15 = arith.addi %4, %14 : vector<1x256xi32>
    %16 = arith.select %13, %15, %4 : vector<1x256xi1>, vector<1x256xi32>
    %c1_i32_3 = arith.constant 1 : i32
    %17 = vector.broadcast %c1_i32_3 : i32 to vector<1x256xi32>
    %18 = arith.cmpi sge, %16, %17 : vector<1x256xi32>
    %c14_i32 = arith.constant 14 : i32
    %19 = vector.broadcast %c14_i32 : i32 to vector<1x256xi32>
    %20 = arith.cmpi sle, %16, %19 : vector<1x256xi32>
    %cst = arith.constant 0.000000e+00 : f32
    %21 = vector.broadcast %cst : f32 to vector<4x512xf32>
    %c0 = arith.constant 0 : index
    %c0_4 = arith.constant 0 : index
    %22 = vector.load %arg11[%c0, %c0_4] : memref<4x512xf32, #tpu.memory_space<vmem>>, vector<4x512xf32>
    tpu.vector_store %arg11[%c0, %c0_4], %21 {strides = array<i32>} : memref<4x512xf32, #tpu.memory_space<vmem>>, vector<4x512xf32>,
    %c0_5 = arith.constant 0 : index
    %c0_6 = arith.constant 0 : index
    %c0_7 = arith.constant 0 : index
    %23 = vector.load %arg1[%c0_5, %c0_6, %c0_7] : memref<1x4x256xf32, #tpu.memory_space<vmem>>, vector<1x4x256xf32>
    %24 = vector.shape_cast %23 : vector<1x4x256xf32> to vector<4x256xf32>
    %c0_8 = arith.constant 0 : index
    %c128 = arith.constant 128 : index
    %25 = vector.load %arg11[%c0_8, %c128] : memref<4x512xf32, #tpu.memory_space<vmem>>, vector<4x256xf32>
    tpu.vector_store %arg11[%c0_8, %c128], %24 {strides = array<i32>} : memref<4x512xf32, #tpu.memory_space<vmem>>, vector<4x256xf32>,
    %c0_9 = arith.constant 0 : index
    %c111 = arith.constant 111 : index
    %26 = vector.load %arg11[%c0_9, %c111] : memref<4x512xf32, #tpu.memory_space<vmem>>, vector<4x256xf32>
    %cst_10 = arith.constant 0.000000e+00 : f32
    %27 = vector.shape_cast %18 : vector<1x256xi1> to vector<1x256xi1>
    %28 = vector.broadcast %27 : vector<1x256xi1> to vector<4x256xi1>
    %29 = vector.broadcast %cst_10 : f32 to vector<4x256xf32>
    %30 = arith.select %28, %26, %29 : vector<4x256xi1>, vector<4x256xf32>
    %c0_11 = arith.constant 0 : index
    %c0_12 = arith.constant 0 : index
    %31 = vector.load %arg12[%c0_11, %c0_12] : memref<36x256xf32, #tpu.memory_space<vmem>>, vector<4x256xf32>
    tpu.vector_store %arg12[%c0_11, %c0_12], %30 {strides = array<i32>} : memref<36x256xf32, #tpu.memory_space<vmem>>, vector<4x256xf32>,
    %c0_13 = arith.constant 0 : index
    %c112 = arith.constant 112 : index
    %32 = vector.load %arg11[%c0_13, %c112] : memref<4x512xf32, #tpu.memory_space<vmem>>, vector<4x256xf32>
    %c4 = arith.constant 4 : index
    %c0_14 = arith.constant 0 : index
    %33 = vector.load %arg12[%c4, %c0_14] : memref<36x256xf32, #tpu.memory_space<vmem>>, vector<4x256xf32>
    tpu.vector_store %arg12[%c4, %c0_14], %32 {strides = array<i32>} : memref<36x256xf32, #tpu.memory_space<vmem>>, vector<4x256xf32>,
    %c0_15 = arith.constant 0 : index
    %c113 = arith.constant 113 : index
    %34 = vector.load %arg11[%c0_15, %c113] : memref<4x512xf32, #tpu.memory_space<vmem>>, vector<4x256xf32>
    %cst_16 = arith.constant 0.000000e+00 : f32
    %35 = vector.shape_cast %20 : vector<1x256xi1> to vector<1x256xi1>
    %36 = vector.broadcast %35 : vector<1x256xi1> to vector<4x256xi1>
    %37 = vector.broadcast %cst_16 : f32 to vector<4x256xf32>
    %38 = arith.select %36, %34, %37 : vector<4x256xi1>, vector<4x256xf32>
    %c8 = arith.constant 8 : index
    %c0_17 = arith.constant 0 : index
    %39 = vector.load %arg12[%c8, %c0_17] : memref<36x256xf32, #tpu.memory_space<vmem>>, vector<4x256xf32>
    tpu.vector_store %arg12[%c8, %c0_17], %38 {strides = array<i32>} : memref<36x256xf32, #tpu.memory_space<vmem>>, vector<4x256xf32>,
    %c0_18 = arith.constant 0 : index
    %c127 = arith.constant 127 : index
    %40 = vector.load %arg11[%c0_18, %c127] : memref<4x512xf32, #tpu.memory_space<vmem>>, vector<4x256xf32>
    %cst_19 = arith.constant 0.000000e+00 : f32
    %41 = vector.shape_cast %18 : vector<1x256xi1> to vector<1x256xi1>
    %42 = vector.broadcast %41 : vector<1x256xi1> to vector<4x256xi1>
    %43 = vector.broadcast %cst_19 : f32 to vector<4x256xf32>
    %44 = arith.select %42, %40, %43 : vector<4x256xi1>, vector<4x256xf32>
    %c12 = arith.constant 12 : index
    %c0_20 = arith.constant 0 : index
    %45 = vector.load %arg12[%c12, %c0_20] : memref<36x256xf32, #tpu.memory_space<vmem>>, vector<4x256xf32>
    tpu.vector_store %arg12[%c12, %c0_20], %44 {strides = array<i32>} : memref<36x256xf32, #tpu.memory_space<vmem>>, vector<4x256xf32>,
    %c0_21 = arith.constant 0 : index
    %c128_22 = arith.constant 128 : index
    %46 = vector.load %arg11[%c0_21, %c128_22] : memref<4x512xf32, #tpu.memory_space<vmem>>, vector<4x256xf32>
    %c16 = arith.constant 16 : index
    %c0_23 = arith.constant 0 : index
    %47 = vector.load %arg12[%c16, %c0_23] : memref<36x256xf32, #tpu.memory_space<vmem>>, vector<4x256xf32>
    tpu.vector_store %arg12[%c16, %c0_23], %46 {strides = array<i32>} : memref<36x256xf32, #tpu.memory_space<vmem>>, vector<4x256xf32>,
    %c0_24 = arith.constant 0 : index
    %c129 = arith.constant 129 : index
    %48 = vector.load %arg11[%c0_24, %c129] : memref<4x512xf32, #tpu.memory_space<vmem>>, vector<4x256xf32>
    %cst_25 = arith.constant 0.000000e+00 : f32
    %49 = vector.shape_cast %20 : vector<1x256xi1> to vector<1x256xi1>
    %50 = vector.broadcast %49 : vector<1x256xi1> to vector<4x256xi1>
    %51 = vector.broadcast %cst_25 : f32 to vector<4x256xf32>
    %52 = arith.select %50, %48, %51 : vector<4x256xi1>, vector<4x256xf32>
    %c20 = arith.constant 20 : index
    %c0_26 = arith.constant 0 : index
    %53 = vector.load %arg12[%c20, %c0_26] : memref<36x256xf32, #tpu.memory_space<vmem>>, vector<4x256xf32>
    tpu.vector_store %arg12[%c20, %c0_26], %52 {strides = array<i32>} : memref<36x256xf32, #tpu.memory_space<vmem>>, vector<4x256xf32>,
    %c0_27 = arith.constant 0 : index
    %c143 = arith.constant 143 : index
    %54 = vector.load %arg11[%c0_27, %c143] : memref<4x512xf32, #tpu.memory_space<vmem>>, vector<4x256xf32>
    %cst_28 = arith.constant 0.000000e+00 : f32
    %55 = vector.shape_cast %18 : vector<1x256xi1> to vector<1x256xi1>
    %56 = vector.broadcast %55 : vector<1x256xi1> to vector<4x256xi1>
    %57 = vector.broadcast %cst_28 : f32 to vector<4x256xf32>
    %58 = arith.select %56, %54, %57 : vector<4x256xi1>, vector<4x256xf32>
    %c24 = arith.constant 24 : index
    %c0_29 = arith.constant 0 : index
    %59 = vector.load %arg12[%c24, %c0_29] : memref<36x256xf32, #tpu.memory_space<vmem>>, vector<4x256xf32>
    tpu.vector_store %arg12[%c24, %c0_29], %58 {strides = array<i32>} : memref<36x256xf32, #tpu.memory_space<vmem>>, vector<4x256xf32>,
    %c0_30 = arith.constant 0 : index
    %c144 = arith.constant 144 : index
    %60 = vector.load %arg11[%c0_30, %c144] : memref<4x512xf32, #tpu.memory_space<vmem>>, vector<4x256xf32>
    %c28 = arith.constant 28 : index
    %c0_31 = arith.constant 0 : index
    %61 = vector.load %arg12[%c28, %c0_31] : memref<36x256xf32, #tpu.memory_space<vmem>>, vector<4x256xf32>
    tpu.vector_store %arg12[%c28, %c0_31], %60 {strides = array<i32>} : memref<36x256xf32, #tpu.memory_space<vmem>>, vector<4x256xf32>,
    %c0_32 = arith.constant 0 : index
    %c145 = arith.constant 145 : index
    %62 = vector.load %arg11[%c0_32, %c145] : memref<4x512xf32, #tpu.memory_space<vmem>>, vector<4x256xf32>
    %cst_33 = arith.constant 0.000000e+00 : f32
    %63 = vector.shape_cast %20 : vector<1x256xi1> to vector<1x256xi1>
    %64 = vector.broadcast %63 : vector<1x256xi1> to vector<4x256xi1>
    %65 = vector.broadcast %cst_33 : f32 to vector<4x256xf32>
    %66 = arith.select %64, %62, %65 : vector<4x256xi1>, vector<4x256xf32>
    %c32 = arith.constant 32 : index
    %c0_34 = arith.constant 0 : index
    %67 = vector.load %arg12[%c32, %c0_34] : memref<36x256xf32, #tpu.memory_space<vmem>>, vector<4x256xf32>
    tpu.vector_store %arg12[%c32, %c0_34], %66 {strides = array<i32>} : memref<36x256xf32, #tpu.memory_space<vmem>>, vector<4x256xf32>,
    %c0_35 = arith.constant 0 : index
    %c0_36 = arith.constant 0 : index
    %68 = vector.load %arg2[%c0_35, %c0_36] : memref<4x36xf32, #tpu.memory_space<vmem>>, vector<4x36xf32>
    %c0_37 = arith.constant 0 : index
    %c0_38 = arith.constant 0 : index
    %69 = vector.load %arg12[%c0_37, %c0_38] : memref<36x256xf32, #tpu.memory_space<vmem>>, vector<36x256xf32>
    %cst_39 = arith.constant dense<0.000000e+00> : vector<4x256xf32>
    %70 = tpu.matmul %68, %69, %cst_39 {dimension_numbers = #tpu.dot_dimension_numbers<[1], [0], [0], [1], [0, 0, 1, 1], [], []>} : vector<4x36xf32>, vector<36x256xf32>, vector<4x256xf32> -> vector<4x256xf32>
    %c0_40 = arith.constant 0 : index
    %c0_41 = arith.constant 0 : index
    %71 = vector.load %arg3[%c0_40, %c0_41] : memref<4x1xf32, #tpu.memory_space<vmem>>, vector<4x1xf32>
    %72 = vector.broadcast %71 : vector<4x1xf32> to vector<4x256xf32>
    %73 = arith.addf %70, %72 : vector<4x256xf32>
    %cst_42 = arith.constant 0.000000e+00 : f32
    %74 = vector.broadcast %cst_42 : f32 to vector<4x256xf32>
    %75 = arith.maximumf %73, %74 : vector<4x256xf32>
    %c0_43 = arith.constant 0 : index
    %c128_44 = arith.constant 128 : index
    %76 = vector.load %arg11[%c0_43, %c128_44] : memref<4x512xf32, #tpu.memory_space<vmem>>, vector<4x256xf32>
    tpu.vector_store %arg11[%c0_43, %c128_44], %75 {strides = array<i32>} : memref<4x512xf32, #tpu.memory_space<vmem>>, vector<4x256xf32>,
    %c0_45 = arith.constant 0 : index
    %c111_46 = arith.constant 111 : index
    %77 = vector.load %arg11[%c0_45, %c111_46] : memref<4x512xf32, #tpu.memory_space<vmem>>, vector<4x256xf32>
    %cst_47 = arith.constant 0.000000e+00 : f32
    %78 = vector.shape_cast %18 : vector<1x256xi1> to vector<1x256xi1>
    %79 = vector.broadcast %78 : vector<1x256xi1> to vector<4x256xi1>
    %80 = vector.broadcast %cst_47 : f32 to vector<4x256xf32>
    %81 = arith.select %79, %77, %80 : vector<4x256xi1>, vector<4x256xf32>
    %c0_48 = arith.constant 0 : index
    %c0_49 = arith.constant 0 : index
    %82 = vector.load %arg12[%c0_48, %c0_49] : memref<36x256xf32, #tpu.memory_space<vmem>>, vector<4x256xf32>
    tpu.vector_store %arg12[%c0_48, %c0_49], %81 {strides = array<i32>} : memref<36x256xf32, #tpu.memory_space<vmem>>, vector<4x256xf32>,
    %c0_50 = arith.constant 0 : index
    %c112_51 = arith.constant 112 : index
    %83 = vector.load %arg11[%c0_50, %c112_51] : memref<4x512xf32, #tpu.memory_space<vmem>>, vector<4x256xf32>
    %c4_52 = arith.constant 4 : index
    %c0_53 = arith.constant 0 : index
    %84 = vector.load %arg12[%c4_52, %c0_53] : memref<36x256xf32, #tpu.memory_space<vmem>>, vector<4x256xf32>
    tpu.vector_store %arg12[%c4_52, %c0_53], %83 {strides = array<i32>} : memref<36x256xf32, #tpu.memory_space<vmem>>, vector<4x256xf32>,
    %c0_54 = arith.constant 0 : index
    %c113_55 = arith.constant 113 : index
    %85 = vector.load %arg11[%c0_54, %c113_55] : memref<4x512xf32, #tpu.memory_space<vmem>>, vector<4x256xf32>
    %cst_56 = arith.constant 0.000000e+00 : f32
    %86 = vector.shape_cast %20 : vector<1x256xi1> to vector<1x256xi1>
    %87 = vector.broadcast %86 : vector<1x256xi1> to vector<4x256xi1>
    %88 = vector.broadcast %cst_56 : f32 to vector<4x256xf32>
    %89 = arith.select %87, %85, %88 : vector<4x256xi1>, vector<4x256xf32>
    %c8_57 = arith.constant 8 : index
    %c0_58 = arith.constant 0 : index
    %90 = vector.load %arg12[%c8_57, %c0_58] : memref<36x256xf32, #tpu.memory_space<vmem>>, vector<4x256xf32>
    tpu.vector_store %arg12[%c8_57, %c0_58], %89 {strides = array<i32>} : memref<36x256xf32, #tpu.memory_space<vmem>>, vector<4x256xf32>,
    %c0_59 = arith.constant 0 : index
    %c127_60 = arith.constant 127 : index
    %91 = vector.load %arg11[%c0_59, %c127_60] : memref<4x512xf32, #tpu.memory_space<vmem>>, vector<4x256xf32>
    %cst_61 = arith.constant 0.000000e+00 : f32
    %92 = vector.shape_cast %18 : vector<1x256xi1> to vector<1x256xi1>
    %93 = vector.broadcast %92 : vector<1x256xi1> to vector<4x256xi1>
    %94 = vector.broadcast %cst_61 : f32 to vector<4x256xf32>
    %95 = arith.select %93, %91, %94 : vector<4x256xi1>, vector<4x256xf32>
    %c12_62 = arith.constant 12 : index
    %c0_63 = arith.constant 0 : index
    %96 = vector.load %arg12[%c12_62, %c0_63] : memref<36x256xf32, #tpu.memory_space<vmem>>, vector<4x256xf32>
    tpu.vector_store %arg12[%c12_62, %c0_63], %95 {strides = array<i32>} : memref<36x256xf32, #tpu.memory_space<vmem>>, vector<4x256xf32>,
    %c0_64 = arith.constant 0 : index
    %c128_65 = arith.constant 128 : index
    %97 = vector.load %arg11[%c0_64, %c128_65] : memref<4x512xf32, #tpu.memory_space<vmem>>, vector<4x256xf32>
    %c16_66 = arith.constant 16 : index
    %c0_67 = arith.constant 0 : index
    %98 = vector.load %arg12[%c16_66, %c0_67] : memref<36x256xf32, #tpu.memory_space<vmem>>, vector<4x256xf32>
    tpu.vector_store %arg12[%c16_66, %c0_67], %97 {strides = array<i32>} : memref<36x256xf32, #tpu.memory_space<vmem>>, vector<4x256xf32>,
    %c0_68 = arith.constant 0 : index
    %c129_69 = arith.constant 129 : index
    %99 = vector.load %arg11[%c0_68, %c129_69] : memref<4x512xf32, #tpu.memory_space<vmem>>, vector<4x256xf32>
    %cst_70 = arith.constant 0.000000e+00 : f32
    %100 = vector.shape_cast %20 : vector<1x256xi1> to vector<1x256xi1>
    %101 = vector.broadcast %100 : vector<1x256xi1> to vector<4x256xi1>
    %102 = vector.broadcast %cst_70 : f32 to vector<4x256xf32>
    %103 = arith.select %101, %99, %102 : vector<4x256xi1>, vector<4x256xf32>
    %c20_71 = arith.constant 20 : index
    %c0_72 = arith.constant 0 : index
    %104 = vector.load %arg12[%c20_71, %c0_72] : memref<36x256xf32, #tpu.memory_space<vmem>>, vector<4x256xf32>
    tpu.vector_store %arg12[%c20_71, %c0_72], %103 {strides = array<i32>} : memref<36x256xf32, #tpu.memory_space<vmem>>, vector<4x256xf32>,
    %c0_73 = arith.constant 0 : index
    %c143_74 = arith.constant 143 : index
    %105 = vector.load %arg11[%c0_73, %c143_74] : memref<4x512xf32, #tpu.memory_space<vmem>>, vector<4x256xf32>
    %cst_75 = arith.constant 0.000000e+00 : f32
    %106 = vector.shape_cast %18 : vector<1x256xi1> to vector<1x256xi1>
    %107 = vector.broadcast %106 : vector<1x256xi1> to vector<4x256xi1>
    %108 = vector.broadcast %cst_75 : f32 to vector<4x256xf32>
    %109 = arith.select %107, %105, %108 : vector<4x256xi1>, vector<4x256xf32>
    %c24_76 = arith.constant 24 : index
    %c0_77 = arith.constant 0 : index
    %110 = vector.load %arg12[%c24_76, %c0_77] : memref<36x256xf32, #tpu.memory_space<vmem>>, vector<4x256xf32>
    tpu.vector_store %arg12[%c24_76, %c0_77], %109 {strides = array<i32>} : memref<36x256xf32, #tpu.memory_space<vmem>>, vector<4x256xf32>,
    %c0_78 = arith.constant 0 : index
    %c144_79 = arith.constant 144 : index
    %111 = vector.load %arg11[%c0_78, %c144_79] : memref<4x512xf32, #tpu.memory_space<vmem>>, vector<4x256xf32>
    %c28_80 = arith.constant 28 : index
    %c0_81 = arith.constant 0 : index
    %112 = vector.load %arg12[%c28_80, %c0_81] : memref<36x256xf32, #tpu.memory_space<vmem>>, vector<4x256xf32>
    tpu.vector_store %arg12[%c28_80, %c0_81], %111 {strides = array<i32>} : memref<36x256xf32, #tpu.memory_space<vmem>>, vector<4x256xf32>,
    %c0_82 = arith.constant 0 : index
    %c145_83 = arith.constant 145 : index
    %113 = vector.load %arg11[%c0_82, %c145_83] : memref<4x512xf32, #tpu.memory_space<vmem>>, vector<4x256xf32>
    %cst_84 = arith.constant 0.000000e+00 : f32
    %114 = vector.shape_cast %20 : vector<1x256xi1> to vector<1x256xi1>
    %115 = vector.broadcast %114 : vector<1x256xi1> to vector<4x256xi1>
    %116 = vector.broadcast %cst_84 : f32 to vector<4x256xf32>
    %117 = arith.select %115, %113, %116 : vector<4x256xi1>, vector<4x256xf32>
    %c32_85 = arith.constant 32 : index
    %c0_86 = arith.constant 0 : index
    %118 = vector.load %arg12[%c32_85, %c0_86] : memref<36x256xf32, #tpu.memory_space<vmem>>, vector<4x256xf32>
    tpu.vector_store %arg12[%c32_85, %c0_86], %117 {strides = array<i32>} : memref<36x256xf32, #tpu.memory_space<vmem>>, vector<4x256xf32>,
    %c0_87 = arith.constant 0 : index
    %c0_88 = arith.constant 0 : index
    %119 = vector.load %arg4[%c0_87, %c0_88] : memref<4x36xf32, #tpu.memory_space<vmem>>, vector<4x36xf32>
    %c0_89 = arith.constant 0 : index
    %c0_90 = arith.constant 0 : index
    %120 = vector.load %arg12[%c0_89, %c0_90] : memref<36x256xf32, #tpu.memory_space<vmem>>, vector<36x256xf32>
    %cst_91 = arith.constant dense<0.000000e+00> : vector<4x256xf32>
    %121 = tpu.matmul %119, %120, %cst_91 {dimension_numbers = #tpu.dot_dimension_numbers<[1], [0], [0], [1], [0, 0, 1, 1], [], []>} : vector<4x36xf32>, vector<36x256xf32>, vector<4x256xf32> -> vector<4x256xf32>
    %c0_92 = arith.constant 0 : index
    %c0_93 = arith.constant 0 : index
    %122 = vector.load %arg5[%c0_92, %c0_93] : memref<4x1xf32, #tpu.memory_space<vmem>>, vector<4x1xf32>
    %123 = vector.broadcast %122 : vector<4x1xf32> to vector<4x256xf32>
    %124 = arith.addf %121, %123 : vector<4x256xf32>
    %cst_94 = arith.constant dense<0.000000e+00> : vector<4xf32>
    %125 = vector.multi_reduction <add>, %124, %cst_94 [1] : vector<4x256xf32> to vector<4xf32>
    %126 = vector.shape_cast %125 : vector<4xf32> to vector<4x1xf32>
    %cst_95 = arith.constant 2.560000e+02 : f32
    %127 = vector.broadcast %cst_95 : f32 to vector<4x1xf32>
    %128 = arith.divf %126, %127 : vector<4x1xf32>
    %c0_96 = arith.constant 0 : index
    %c0_97 = arith.constant 0 : index
    %129 = vector.load %arg6[%c0_96, %c0_97] : memref<4x512xf32, #tpu.memory_space<vmem>>, vector<4x512xf32>
    %130 = vector.broadcast %128 : vector<4x1xf32> to vector<4x512xf32>
    %131 = arith.mulf %130, %129 : vector<4x512xf32>
    %cst_98 = arith.constant dense<0.000000e+00> : vector<512xf32>
    %132 = vector.multi_reduction <add>, %131, %cst_98 [0] : vector<4x512xf32> to vector<512xf32>
    %133 = vector.shape_cast %132 : vector<512xf32> to vector<1x512xf32>
    %cst_99 = arith.constant 0.000000e+00 : f32
    %134 = vector.broadcast %cst_99 : f32 to vector<1x512xf32>
    %135 = arith.maximumf %133, %134 : vector<1x512xf32>
    %c0_100 = arith.constant 0 : index
    %c0_101 = arith.constant 0 : index
    %136 = vector.load %arg7[%c0_100, %c0_101] : memref<4x512xf32, #tpu.memory_space<vmem>>, vector<4x512xf32>
    %137 = vector.broadcast %135 : vector<1x512xf32> to vector<4x512xf32>
    %138 = arith.mulf %137, %136 : vector<4x512xf32>
    %cst_102 = arith.constant dense<0.000000e+00> : vector<4xf32>
    %139 = vector.multi_reduction <add>, %138, %cst_102 [1] : vector<4x512xf32> to vector<4xf32>
    %140 = vector.shape_cast %139 : vector<4xf32> to vector<4x1xf32>
    %141 = arith.negf %140 : vector<4x1xf32>
    %142 = math.exp %141 : vector<4x1xf32>
    %cst_103 = arith.constant 1.000000e+00 : f32
    %143 = vector.broadcast %cst_103 : f32 to vector<4x1xf32>
    %144 = arith.addf %143, %142 : vector<4x1xf32>
    %145 = arith.divf %143, %144 : vector<4x1xf32>
    %146 = vector.broadcast %145 : vector<4x1xf32> to vector<4x256xf32>
    %147 = arith.mulf %124, %146 : vector<4x256xf32>
    %148 = arith.addf %147, %24 : vector<4x256xf32>
    %c0_104 = arith.constant 0 : index
    %c0_105 = arith.constant 0 : index
    %149 = vector.load %arg8[%c0_104, %c0_105] : memref<4x4xf32, #tpu.memory_space<vmem>>, vector<4x4xf32>
    %cst_106 = arith.constant dense<0.000000e+00> : vector<4x256xf32>
    %150 = tpu.matmul %149, %148, %cst_106 {dimension_numbers = #tpu.dot_dimension_numbers<[1], [0], [0], [1], [0, 0, 1, 1], [], []>} : vector<4x4xf32>, vector<4x256xf32>, vector<4x256xf32> -> vector<4x256xf32>
    %c0_107 = arith.constant 0 : index
    %c0_108 = arith.constant 0 : index
    %151 = vector.load %arg9[%c0_107, %c0_108] : memref<4x1xf32, #tpu.memory_space<vmem>>, vector<4x1xf32>
    %152 = vector.broadcast %151 : vector<4x1xf32> to vector<4x256xf32>
    %153 = arith.addf %150, %152 : vector<4x256xf32>
    %c0_109 = arith.constant 0 : index
    %c0_110 = arith.constant 0 : index
    %c0_111 = arith.constant 0 : index
    %154 = vector.load %arg10[%c0_109, %c0_110, %c0_111] : memref<1x4x256xf32, #tpu.memory_space<vmem>>, vector<1x4x256xf32>
    %155 = vector.shape_cast %154 : vector<1x4x256xf32> to vector<4x256xf32>
    %156 = vector.shape_cast %153 : vector<4x256xf32> to vector<1x4x256xf32>
    tpu.vector_store %arg10[%c0_109, %c0_110, %c0_111], %156 {strides = array<i32>} : memref<1x4x256xf32, #tpu.memory_space<vmem>>, vector<1x4x256xf32>,
    return
  }
  func.func @transform_0(%arg0: i32) -> (i32, i32, i32) {
    %c0_i32 = arith.constant 0 : i32
    %c0_i32_0 = arith.constant 0 : i32
    %c0_i32_1 = arith.constant 0 : i32
    return %arg0, %c0_i32, %c0_i32_0 : i32, i32, i32
  }
  func.func @transform_1(%arg0: i32) -> (i32, i32) {
    %c0_i32 = arith.constant 0 : i32
    %c0_i32_0 = arith.constant 0 : i32
    %c0_i32_1 = arith.constant 0 : i32
    return %c0_i32, %c0_i32_0 : i32, i32
  }
  func.func @transform_2(%arg0: i32) -> (i32, i32) {
    %c0_i32 = arith.constant 0 : i32
    %c0_i32_0 = arith.constant 0 : i32
    %c0_i32_1 = arith.constant 0 : i32
    return %c0_i32, %c0_i32_0 : i32, i32
  }
  func.func @transform_3(%arg0: i32) -> (i32, i32) {
    %c0_i32 = arith.constant 0 : i32
    %c0_i32_0 = arith.constant 0 : i32
    %c0_i32_1 = arith.constant 0 : i32
    return %c0_i32, %c0_i32_0 : i32, i32
  }
  func.func @transform_4(%arg0: i32) -> (i32, i32) {
    %c0_i32 = arith.constant 0 : i32
    %c0_i32_0 = arith.constant 0 : i32
    %c0_i32_1 = arith.constant 0 : i32
    return %c0_i32, %c0_i32_0 : i32, i32
  }
  func.func @transform_5(%arg0: i32) -> (i32, i32) {
    %c0_i32 = arith.constant 0 : i32
    %c0_i32_0 = arith.constant 0 : i32
    %c0_i32_1 = arith.constant 0 : i32
    return %c0_i32, %c0_i32_0 : i32, i32
  }
  func.func @transform_6(%arg0: i32) -> (i32, i32) {
    %c0_i32 = arith.constant 0 : i32
    %c0_i32_0 = arith.constant 0 : i32
    %c0_i32_1 = arith.constant 0 : i32
    return %c0_i32, %c0_i32_0 : i32, i32
  }
  func.func @transform_7(%arg0: i32) -> (i32, i32) {
    %c0_i32 = arith.constant 0 : i32
    %c0_i32_0 = arith.constant 0 : i32
    %c0_i32_1 = arith.constant 0 : i32
    return %c0_i32, %c0_i32_0 : i32, i32
  }
  func.func @transform_8(%arg0: i32) -> (i32, i32) {
    %c0_i32 = arith.constant 0 : i32
    %c0_i32_0 = arith.constant 0 : i32
    %c0_i32_1 = arith.constant 0 : i32
    return %c0_i32, %c0_i32_0 : i32, i32
  }
  func.func @transform_9(%arg0: i32) -> (i32, i32, i32) {
    %c0_i32 = arith.constant 0 : i32
    %c0_i32_0 = arith.constant 0 : i32
    %c0_i32_1 = arith.constant 0 : i32
    return %arg0, %c0_i32, %c0_i32_0 : i32, i32, i32
  }
}

</mosaic_0001>

<bundles_post_ra>
// kernel: tpu_custom_call.1
= control target key start
LH: loop header
LB: loop body
LE: loop exit
PB: predicated region body
PF: predicated region fallthrough
CT: control target
= control target key end

     0   :  { %s1977_s0 = inlined_call_operand.hbm [shape: f32[2,4,256], index: 0, kind: input, shape index: {}]   ;;  %s1978_s1 = inlined_call_operand.vmem [shape: f32[4,36], index: 1, kind: input, shape index: {}]   ;;  %s1979_s2 = inlined_call_operand.vmem [shape: f32[4,1], index: 2, kind: input, shape index: {}]   ;;  %s1980_s3 = inlined_call_operand.vmem [shape: f32[4,36], index: 3, kind: input, shape index: {}]   ;;  %s1981_s4 = inlined_call_operand.vmem [shape: f32[4,1], index: 4, kind: input, shape index: {}]   ;;  %s1982_s5 = inlined_call_operand.vmem [shape: f32[4,512], index: 5, kind: input, shape index: {}]   ;;  %s1983_s6 = inlined_call_operand.hbm [shape: f32[4,512], index: 6, kind: input, shape index: {}]   ;;  %s1984_s7 = inlined_call_operand.hbm [shape: f32[4,4], index: 7, kind: input, shape index: {}]   ;;  %s1985_s8 = inlined_call_operand.vmem [shape: f32[4,1], index: 8, kind: input, shape index: {}]   ;;  %s1986_s9 = inlined_call_operand.hbm [shape: f32[2,4,256], index: 9, kind: output, shape index: {}]  }
   0x1   :  { %1992 = sst [smem:[#allocation16_spill]] %s1983_s6 }
   0x2   :  { %1993 = sst [smem:[#allocation17_spill]] %s1984_s7 }
   0x3   :  { %14 = vsyncpa [#allocation5], 0 }
   0x4   :  { %16 = vsyncpa [#allocation5 + $0x1], 0 }
   0x5   :  { %17 = vsyncpa [#allocation8], 0 }
   0x6   :  { %18 = vsyncpa [#allocation6], 0 }
   0x7   :  { %20 = vsyncpa [#allocation6 + $0x1], 0  ;;  %s1588_s30 = smov 0   ;;  %s1590_s10 = smov 0  }
   0x8   :  { %s1592_s11 = smov 0   ;;  %s1594_s12 = smov 0  }
   0x9 LB: > { %1994 = sst [smem:[#allocation14_spill]] %s1518_s11  ;;  %s1609_s13 = sadd.s32 4294967295, %s1522_s12   ;;  %s1522_s12 = sphi %s1594_s12, %s2024_s12   ;;  %s1518_s11 = sphi %s1592_s11, %s2021_s11   ;;  %s1514_s10 = sphi %s1590_s10, %s2023_s10   ;;  %s1510_s30 = sphi %s1588_s30, %s2022_s30  }
   0xa   : > { %s1246_s14 = sadd.s32 4294967294, %s1522_s12   ;;  %p46_p0 = scmp.ne.s32.totalorder %s1514_s10, %s1510_s30 }
   0xb   : > { %p1987_p1 = scmp.eq.s32.totalorder %s1609_s13, 0  ;;  %p244_p3 = scmp.eq.s32.totalorder %s1246_s14, 1 }
   0xc   : > { %p1247_p5 = scmp.ge.s32.totalorder %s1522_s12, 1  ;;  %p251_p7 = scmp.lt.s32.totalorder %s1522_s12, 3 }
   0xd   : > { %p1618_p4 = por %p1987_p1, %p46_p0  ;;  %p1623_p6 = por %p244_p3, %p46_p0 }
   0xe   : > { %p1628_p8 = pnand %p1247_p5, %p251_p7  ;;  %s1524_s18 = smov [#allocation7]  }
   0xf   : > { %s1995_s15 = scalar_select %p1618_p4, 1, 0 }
  0x10   : > { %s1996_s16 = scalar_select %p1623_p6, 1, 0 }
  0x11   : > { %s1997_s17 = scalar_select %p1628_p8, 1, 0 }
  0x12   : > { %s279_s19 = sshll.u32 %s1524_s18, 4  ;;  %p1288_p10 = pneg %p1628_p8  ;;  %s280_s19 = int_to_ptr.vmem [resolvable:$true] %s279_s19 }
  0x13   : > { %s1525_s20 = smov [#allocation9]   ;;  %s1642_s23 = sadd.s32 1, %s1522_s12  }
  0x14   : > { %s290_s21 = sshll.u32 %s1525_s20, 4  ;;  %p1637_p11 = pnand %p1288_p10, %p1987_p1  ;;  %s291_s21 = int_to_ptr.vmem [resolvable:$true] %s290_s21 }
  0x15   : > { %s30_s24 = ssub.s32 %s1522_s12, %s1642_s23  ;;  %s1385_s25 = scalar_lea.vmem %s280_s19, 256 }
  0x16   : > { %p1376_p12 = pneg %p1637_p11  ;;  %p1386_p13 = scmp.ne.s32.totalorder %s280_s19, %s1385_s25 }
  0x17   : > { %p1393_p5 = scmp.lt.s32.totalorder %s280_s19, %s280_s19  ;;  %p1394_p7 = scmp.lt.s32.totalorder %s1385_s25, %s1385_s25 }
  0x18   : > { %p1388_p0 = pnand %p1386_p13, %p1376_p12 }
  0x19   : > { %p1395_p10 = por %p1394_p7, %p1393_p5 }
  0x1a   : > { %p1389_p3 = pneg %p1388_p0 }
  0x1c   : > { %p1396_p9 = pnand %p1395_p10, %p1389_p3 }
  0x1e   : > { %1399 = shalt.err (!%p1396_p9)
}
  0x1f   : > { %s1999_s6 = sld [smem:[#allocation16_spill]]  ;;  %s1411_s28 = scalar_lea.vmem %s291_s21, 64 }
  0x20   : > { %p1412_p1 = scmp.ne.s32.totalorder %s291_s21, %s1411_s28  ;;  %p1419_p13 = scmp.lt.s32.totalorder %s291_s21, %s291_s21 }
  0x21   : > { %p1420_p0 = scmp.lt.s32.totalorder %s1411_s28, %s1411_s28 }
  0x22   : > { %p1414_p2 = pnand %p1412_p1, %p1376_p12 }
  0x23   : > { %p1421_p4 = por %p1420_p0, %p1419_p13 }
  0x24   : > { %p1415_p6 = pneg %p1414_p2 }
  0x25   : > { %1291 = dma.hbm_to_vmem [thread:$0]  (!%p1637_p11), %s1999_s6, 256, %s280_s19, [#allocation8]  }
  0x26   : > { %p1422_p8 = pnand %p1421_p4, %p1415_p6 }
  0x28   : > { %1425 = shalt.err (!%p1422_p8)
}
  0x29   : > { %s2000_s7 = sld [smem:[#allocation17_spill]]  ;;  %p31_p1 = scmp.eq.s32.totalorder %s30_s24, 0 }
  0x2a   : > { %s33_s18 = sadd.s32 1, %s1518_s11  ;;  %p40_p2 = scmp.ne.s32.totalorder %s1518_s11, %s1514_s10 }
  0x2b   : > { %p41_p4 = scmp.eq.s32.totalorder %s1522_s12, 0  ;;  %p2002_p8 = scmp.eq.s32.totalorder %s1609_s13, 1 }
  0x2c   : > { %s1669_s19 = scalar_select %p31_p1, %s1518_s11, %s33_s18  }
  0x2d   : > { %p42_p6 = por %p41_p4, %p40_p2  ;;  %p1673_p9 = por %p2002_p8, %p40_p2 }
  0x2e   : > { %2001 = sst [smem:[#allocation15_spill]] %s1669_s19  ;;  %p1305_p12 = scmp.lt.s32.totalorder %s1522_s12, 2 }
  0x2f   : > { %1294 = dma.hbm_to_vmem [thread:$0]  (!%p1637_p11), %s2000_s7, 64, %s291_s21, [#allocation8]  }
  0x30   : > { %s2003_s20 = scalar_select %p1673_p9, 1, 0 }
  0x31   : > { %s304_s22 = sand.u32 1, %s1518_s11   ;;  %s1274_s26 = sshll.u32 %s1522_s12, 7 }
  0x32   : > { %s1251_s25 = sshll.u32 %s304_s22, 3  ;;  %s1683_s21 = scalar_lea.hbm %s1977_s0, %s1274_s26 }
  0x33   : > { %s308_s24 = scalar_lea.vmem [#allocation4], %s1251_s25  ;;  %p1685_p11 = pnand %p1305_p12, %p42_p6 }
  0x34   : > { %s316_s29 = sshll.u32 %s308_s24, 4  ;;  %s305_s18 = scalar_lea.sflag [#allocation5], %s304_s22  ;;  %s317_s29 = int_to_ptr.vmem [resolvable:$true] %s316_s29 }
  0x35   : > { %s1426_s6 = scalar_lea.hbm %s1683_s21, 128  ;;  %p1428_p5 = pneg %p1685_p11 }
  0x36   : > { %p1427_p3 = scmp.ne.s32.totalorder %s1683_s21, %s1426_s6  ;;  %s1431_s28 = scalar_lea.hbm %s1977_s0, 256 }
  0x37   : > { %p1432_p13 = scmp.lt.s32.totalorder %s1683_s21, %s1977_s0  ;;  %p1433_p0 = scmp.lt.s32.totalorder %s1431_s28, %s1426_s6 }
  0x38   : > { %p1429_p7 = pnand %p1428_p5, %p1427_p3 }
  0x39   : > { %p1434_p1 = por %p1433_p0, %p1432_p13 }
  0x3a   : > { %p1430_p10 = pneg %p1429_p7 }
  0x3c   : > { %p1435_p2 = pnand %p1434_p1, %p1430_p10 }
  0x3e   : > { %1438 = shalt.err (!%p1435_p2)
}
  0x3f   : > { %s1439_s24 = scalar_lea.vmem %s317_s29, 128  ;;  %s1526_s22 = smov [#allocation4]  }
  0x40   : > { %p1440_p4 = scmp.ne.s32.totalorder %s317_s29, %s1439_s24  ;;  %s1444_s19 = sshll.u32 %s1526_s22, 4  ;;  %s1445_s19 = int_to_ptr.vmem [resolvable:$false] %s1444_s19 }
  0x41   : > { %s1446_s11 = scalar_lea.vmem %s1445_s19, 256  ;;  %p1447_p12 = scmp.lt.s32.totalorder %s317_s29, %s1445_s19 }
  0x42   : > { %p1442_p6 = pnand %p1440_p4, %p1428_p5  ;;  %p1448_p3 = scmp.lt.s32.totalorder %s1446_s11, %s1439_s24 }
  0x44   : > { %p1443_p8 = pneg %p1442_p6  ;;  %p1449_p7 = por %p1448_p3, %p1447_p12 }
  0x46   : > { %p1450_p9 = pnand %p1449_p7, %p1443_p8 }
  0x48   : > { %1453 = shalt.err (!%p1450_p9)
}
  0x49   : > { %1298 = dma.hbm_to_vmem [thread:$0]  (!%p1685_p11), %s1683_s21, 128, %s317_s29, %s305_s18  }
  0x4a   : > { %p2005_p10 = scmp.ne.s32.totalorder %s1997_s17, 0 }
  0x4b   : > { %s1706_s6 = sand.u32 (!%p2005_p10), 1, %s1514_s10   ;;  %p2006_p5 = scmp.ne.s32.totalorder (!%p2005_p10), %s1995_s15, 0 }
  0x4c   : > { %325 = sbr.rel (%p2005_p10) target bundleno = 1388 (0x56c), region = 56  ;;  %s1255_s7 = sshll.u32 (!%p2005_p10), %s1706_s6, 3 }
  0x4d   : > { %s328_s19 = scalar_lea.sflag (!%p2005_p10), [#allocation5], %s1706_s6  ;;  %s331_s11 = scalar_lea.vmem (!%p2005_p10), [#allocation4], %s1255_s7 }
  0x51   : > { %1497 = dma.done.wait (%p2006_p5), %s328_s19, 128  }
  0x52   : > { %1499 = vsyncadd (%p2006_p5), %s328_s19, 4294967168  ;;  %p2007_p9 = scmp.eq.s32.totalorder %s1609_s13, 0 }
  0x54   : > { %1501 = dma.done.wait (%p2007_p9), [#allocation8], 320   ;;  %p2008_p11 = pmov %p2007_p9 }
  0x55   : > { %v1527_v0 = vmov 0.0   ;;  %v1724_v1 = vld [vmem:[%s331_s11] sm:$0xff]  ;;  %s1528_s15 = smov 111   ;;  %s1529_s17 = smov 127   ;;  %v1536_v15 = vmov 0   ;;  %v374_v17 = vlaneseq  ;;  %vm519_vm0 = vcmask 1039360  }
  0x56   : > { %1503 = vsyncadd (%p2008_p11), [#allocation8], 4294966976  ;;  %406 = vst [vmem:[#allocation2 + $0x8] sm:$0xff] %v1527_v0  ;;  %685 = vmatprep.mubr.f32.mxu0 %v1527_v0  ;;  %957 = vmatprep.mubr.f32.mxu1 %v1527_v0  ;;  %v1731_v3 = vcombine.high %v1724_v1, %v1724_v1  ;;  %s1530_s21 = smov 112   ;;  %s1531_s29 = smov 113   ;;  %v558_v9 = vcombine.low %v1724_v1, %v1724_v1  ;;  %vm584_vm3 = vcmask 908288  }
  0x57   : > { %405 = vst [vmem:[#allocation2] sm:$0xff] %v1527_v0  ;;  %578 = vrot.lane.b32.xlu1 %v1724_v1, %s1528_s15  ;;  %506 = vst [vmem:[#allocation3 + $0x48] sm:$0xf] %v1724_v1  ;;  %s1532_s14 = smov 1   ;;  %s1533_s18 = smov 15   ;;  %1353 = vset.pattern.permute.xlu0 %v1536_v15  ;;  %v375_v18 = vand.u32 127, %v374_v17 }
  0x58   : > { %408 = vst [vmem:[#allocation2 + $0x4] sm:$0xff] %v1724_v1  ;;  %507 = vst [vmem:[#allocation3 + $0x28] sm:$0xf] %v1731_v3  ;;  %s1534_s26 = smov 17   ;;  %s1535_s27 = smov 16   ;;  %vm545_vm4 = vcmask 924672  }
  0x59   : > { %v604_v16 = vld [vmem:[%s1979_s2] sm:$0xf]  ;;  %v376_v21 = vadd.s32 128, %v375_v18  ;;  %v381_v24 = vand.u32 15, %v375_v18  ;;  %vm566_vm7 = vcmask 916480   ;;  %vm487_vm8 = vcmask 7168  }
  0x5a   : > { %vm614_vm9 = vcmask 1043456   ;;  %vm467_vm10 = vcmask 121856   ;;  %vm424_vm11 = vcmask 138240   ;;  %vm445_vm12 = vcmask 130048   ;;  %v867_v29 = vld [vmem:[%s1980_s3] sm:$0xf] }
  0x5b   : > { %513 = vrot.lane.b32.xlu1 %v1724_v1, %s1529_s17  ;;  %v388_v25 = vand.u32 15, %v376_v21  ;;  %vm1769_vm1 = vcmp.le.s32.totalorder %v381_v24, 14  ;;  %vm1783_vm5 = vcmp.ge.s32.totalorder %v381_v24, 1  ;;  %vm610_vm13 = vcmask 293888   ;;  %s1275_s28 = sshll.u32 %s1609_s13, 7  ;;  %s373_s25 = scalar_lea.vmem [#allocation10], %s1255_s7 }
  0x5c   : > { %vm1056_vm14 = vcmask 31744   ;;  %s1157_s24 = sshll.u32 %s373_s25, 4  ;;  %s1155_s11 = scalar_lea.hbm %s1986_s9, %s1275_s28  ;;  %s1158_s24 = int_to_ptr.vmem [resolvable:$true] %s1157_s24 }
  0x5d   : > { %v574_v2 = vld [vmem:[#allocation2 + $0xc] sm:$0xf]  ;;  %vm1773_vm2 = vcmp.le.s32.totalorder %v388_v25, 14  ;;  %vm1787_vm6 = vcmp.ge.s32.totalorder %v388_v25, 1  ;;  %p2017_p0 = scmp.ne.s32.totalorder %s2003_s20, 0 }
  0x5e   : > { %582 = vrot.lane.b32.xlu0 %v574_v2, %s1528_s15  ;;  %v509_v4 = vld [vmem:[#allocation2 + $0xc] sm:$0xf] }
  0x5f   : > { %v535_v5 = vld [vmem:[#allocation2 + $0xc] sm:$0xf]  ;;  %562 = vrot.lane.b32.xlu1 %v1724_v1, %s1530_s21  ;;  %v476_v6 = vld [vmem:[#allocation2] sm:$0xff]  ;;  %v477_v10 = vld [vmem:[#allocation2 + $0x8] sm:$0xf] }
  0x60   : > { %v480_v7 = vcombine.high %v476_v6, %v476_v6  ;;  %v1355_v8 = vld [vmem:[#allocation2 + $0xc] ss:$0 sps:$4 sm:$0xff]   ;;  %v453_v11 = vld [vmem:[#allocation2 + $0x8] sm:$0xf]  ;;  %v437_v13 = vcombine.low %v476_v6, %v476_v6 }
  0x61   : > { %v410_v12 = vld [vmem:[#allocation2 + $0x8] sm:$0xf] }
  0x62   : > { %517 = vrot.lane.b32.xlu0 %v509_v4, %s1529_s17  ;;  %v1358_v14 = vld [vmem:[#allocation2 + $0x8] ss:$0 sps:$4 sm:$0xff]  }
  0x63   : > { %515 = vrot.lane.b32.xlu1 %v1731_v3, %s1529_s17 }
  0x66   : > { %543 = vrot.lane.b32.xlu0 %v535_v5, %s1531_s29 }
  0x67   : > { %541 = vrot.lane.b32.xlu1 %v1731_v3, %s1531_s29 }
  0x6a   : > { %539 = vrot.lane.b32.xlu0 %v1724_v1, %s1531_s29 }
  0x6b   : > { %483 = vrot.lane.b32.xlu1 %v480_v7, %s1532_s14 }
  0x6e   : > { %580 = vrot.lane.b32.xlu0 %v1731_v3, %s1528_s15 }
  0x6f   : > { %560 = vrot.lane.b32.xlu1 %v558_v9, %s1530_s21 }
  0x72   : > { %564 = vrot.lane.b32.xlu0 %v1355_v8, %s1530_s21 }
  0x73   : > { %463 = vrot.lane.b32.xlu1 %v480_v7, %s1533_s18 }
  0x76   : > { %485 = vrot.lane.b32.xlu0 %v477_v10, %s1532_s14 }
  0x77   : > { %461 = vrot.lane.b32.xlu1 %v476_v6, %s1533_s18 }
  0x7a   : > { %481 = vrot.lane.b32.xlu0 %v476_v6, %s1532_s14 }
  0x7b   : > { %422 = vrot.lane.b32.xlu1 %v410_v12, %s1534_s26 }
  0x7e   : > { %465 = vrot.lane.b32.xlu0 %v453_v11, %s1533_s18 }
  0x7f   : > { %441 = vrot.lane.b32.xlu1 %v476_v6, %s1535_s27 }
  0x82   : > { %420 = vrot.lane.b32.xlu0 %v480_v7, %s1534_s26 }
  0x83   : > { %439 = vrot.lane.b32.xlu1 %v437_v13, %s1535_s27 }
  0x86   : > { %418 = vrot.lane.b32.xlu0 %v476_v6, %s1534_s26 }
  0x8a   : > { %443 = vrot.lane.b32.xlu0 %v1358_v14, %s1535_s27 }
  0x8e   : > { %607 = vperm.xlu0 %1353, %v604_v16  }
  0xc9   : > { %v579_v19 = vpop.permute.xlu1 %578 }
  0xcd   : > { %v514_v22 = vpop.permute.xlu1 %513 }
  0xd0   : > { %v583_v20 = vpop.permute.xlu0 %582 }
  0xd1   : > { %v563_v26 = vpop.permute.xlu1 %562 }
  0xd4   : > { %v518_v23 = vpop.permute.xlu0 %517 }
  0xd5   : > { %v516_v30 = vpop.permute.xlu1 %515 }
  0xd6   : > { %v520_v32 = vsel %vm519_vm0, %v514_v22, %v516_v30  ;;  %v521_v33 = vsel %vm519_vm0, %v516_v30, %v518_v23 }
  0xd7   : > { %v524_v34 = vsel %vm1769_vm1, %v520_v32, 0.0  ;;  %v525_v35 = vsel %vm1773_vm2, %v521_v33, 0.0  ;;  %v593_v32 = vld [vmem:[%s1978_s1] sm:$0xf] }
  0xd8   : > { %v544_v27 = vpop.permute.xlu0 %543  ;;  %v528_v36 = vrot.slane %v524_v34, 4  ;;  %v529_v37 = vrot.slane %v525_v35, 4  ;;  %v787_v34 = vld [vmem:[#allocation2 + $0xc] sm:$0xf] }
  0xd9   : > { %v542_v40 = vpop.permute.xlu1 %541  ;;  %795 = vrot.lane.b32.xlu0 %v787_v34, %s1529_s17  ;;  %v812_v35 = vld [vmem:[#allocation2 + $0xc] sm:$0xf] }
  0xda   : > { %532 = vst [vmem:[#allocation3 + $0x48] sm:$0xf0] %v528_v36  ;;  %533 = vst [vmem:[#allocation3 + $0x28] sm:$0xf0] %v529_v37  ;;  %v547_v43 = vsel %vm545_vm4, %v542_v40, %v544_v27  ;;  %v1360_v36 = vld [vmem:[#allocation2 + $0xc] ss:$0 sps:$4 sm:$0xff]  }
  0xdb   : > { %v551_v47 = vsel %vm1787_vm6, %v547_v43, 0.0  ;;  %v849_v37 = vld [vmem:[#allocation2 + $0xc] sm:$0xf] }
  0xdc   : > { %v540_v31 = vpop.permute.xlu0 %539  ;;  %553 = vst [vmem:[#allocation3 + $0x20] sm:$0xf] %v551_v47  ;;  %857 = vrot.lane.b32.xlu1 %v849_v37, %s1528_s15 }
  0xdd   : > { %v546_v42 = vsel %vm545_vm4, %v540_v31, %v542_v40  ;;  %v484_v50 = vpop.permute.xlu1 %483  ;;  %820 = vrot.lane.b32.xlu0 %v812_v35, %s1531_s29 }
  0xde   : > { %v550_v46 = vsel %vm1783_vm5, %v546_v42, 0.0 }
  0xdf   : > { %552 = vst [vmem:[#allocation3 + $0x8] sm:$0xf] %v550_v46 }
  0xe0   : > { %v581_v41 = vpop.permute.xlu0 %580 }
  0xe1   : > { %v585_v44 = vsel %vm584_vm3, %v579_v19, %v581_v41  ;;  %v586_v45 = vsel %vm584_vm3, %v581_v41, %v583_v20  ;;  %v561_v53 = vpop.permute.xlu1 %560  ;;  %v599_v12 = vld [vmem:[#allocation3 + $0x28] sm:$0xff]  ;;  %840 = vrot.lane.b32.xlu0 %v1360_v36, %s1530_s21 }
  0xe2   : > { %v589_v48 = vsel %vm1769_vm1, %v585_v44, 0.0  ;;  %v590_v49 = vsel %vm1773_vm2, %v586_v45, 0.0  ;;  %v567_v55 = vsel %vm566_vm7, %v561_v53, %v563_v26  ;;  %v598_v14 = vld [vmem:[#allocation3 + $0x48] sm:$0xff] }
  0xe3   : > { %591 = vst [vmem:[#allocation3 + $0x40] sm:$0xf] %v589_v48  ;;  %592 = vst [vmem:[#allocation3 + $0x38] sm:$0xf] %v590_v49 }
  0xe4   : > { %v565_v51 = vpop.permute.xlu0 %564  ;;  %571 = vst [vmem:[#allocation3 + $0x8] sm:$0xf0] %v567_v55 }
  0xe5   : > { %v568_v52 = vsel %vm566_vm7, %v563_v26, %v565_v51  ;;  %v464_v61 = vpop.permute.xlu1 %463 }
  0xe6   : > { %572 = vst [vmem:[#allocation3 + $0x20] sm:$0xf0] %v568_v52 }
  0xe8   : > { %v486_v54 = vpop.permute.xlu0 %485 }
  0xe9   : > { %v489_v56 = vsel %vm487_vm8, %v484_v50, %v486_v54  ;;  %v462_v6 = vpop.permute.xlu1 %461  ;;  %v878_v54 = vld [vmem:[%s1981_s4] sm:$0xf] }
  0xea   : > { %v603_v57 = vld [vmem:[#allocation3 + $0x38] sm:$0xf]  ;;  %v493_v58 = vsel %vm1787_vm6, %v489_v56, 0.0  ;;  %v602_v59 = vld [vmem:[#allocation3 + $0x40] sm:$0xf]  ;;  %v468_v8 = vsel %vm467_vm10, %v462_v6, %v464_v61 }
  0xeb   : > { %1259 = vmatprep.subr.msk.mxu0 %vm614_vm9, %v603_v57  ;;  %v497_v60 = vrot.slane %v493_v58, 4  ;;  %v600_v9 = vld [vmem:[#allocation3 + $0x8] sm:$0xff]  ;;  %v472_v11 = vsel %vm1769_vm1, %v468_v8, 0.0 }
  0xec   : > { %1260 = vmatpush1.msk.msra.mxu0 %vm614_vm9, %v602_v59  ;;  %v482_v62 = vpop.permute.xlu0 %481  ;;  %474 = vst [vmem:[#allocation3 + $0x18] sm:$0xf] %v472_v11 }
  0xed   : > { %501 = vst [vmem:[#allocation3 + $0x10] sm:$0xf0] %v497_v60  ;;  %v488_v63 = vsel %vm487_vm8, %v482_v62, %v484_v50  ;;  %v601_v2 = vld [vmem:[#allocation3 + $0x20] sm:$0xff]  ;;  %v423_v15 = vpop.permute.xlu1 %422 }
  0xee   : > { %v492_v4 = vsel %vm1783_vm5, %v488_v63, 0.0  ;;  %645 = vmatprep.subr.mxu0 %v601_v2 }
  0xef   : > { %v496_v5 = vrot.slane %v492_v4, 4  ;;  %646 = vmatpush1.msra.mxu0 %v600_v9 }
  0xf0   : > { %v466_v7 = vpop.permute.xlu0 %465  ;;  %647 = vmatprep.subr.mxu0 %v599_v12 }
  0xf1   : > { %500 = vst [vmem:[#allocation3 + $0x18] sm:$0xf0] %v496_v5  ;;  %v469_v10 = vsel %vm467_vm10, %v464_v61, %v466_v7  ;;  %648 = vmatpush1.msra.mxu0 %v598_v14  ;;  %v442_v19 = vpop.permute.xlu1 %441 }
  0xf2   : > { %v473_v13 = vsel %vm1773_vm2, %v469_v10, 0.0 }
  0xf3   : > { %475 = vst [vmem:[#allocation3 + $0x10] sm:$0xf] %v473_v13 }
  0xf4   : > { %v421_v16 = vpop.permute.xlu0 %420 }
  0xf5   : > { %v426_v17 = vsel %vm424_vm11, %v421_v16, %v423_v15  ;;  %v440_v25 = vpop.permute.xlu1 %439 }
  0xf6   : > { %v430_v18 = vsel %vm1787_vm6, %v426_v17, 0.0  ;;  %v446_v27 = vsel %vm445_vm12, %v440_v25, %v442_v19 }
  0xf7   : > { %432 = vst [vmem:[#allocation3] sm:$0xf] %v430_v18  ;;  %450 = vst [vmem:[#allocation3 + $0x30] sm:$0xf0] %v446_v27 }
  0xf8   : > { %v419_v20 = vpop.permute.xlu0 %418  ;;  %v596_v24 = vld [vmem:[#allocation3 + $0x18] sm:$0xff] }
  0xf9   : > { %v425_v21 = vsel %vm424_vm11, %v419_v20, %v421_v16 }
  0xfa   : > { %v429_v22 = vsel %vm1783_vm5, %v425_v21, 0.0  ;;  %v597_v23 = vld [vmem:[#allocation3 + $0x10] sm:$0xff] }
  0xfb   : > { %431 = vst [vmem:[#allocation3 + $0x30] sm:$0xf] %v429_v22  ;;  %649 = vmatprep.subr.mxu0 %v597_v23 }
  0xfc   : > { %v444_v26 = vpop.permute.xlu0 %443  ;;  %650 = vmatpush1.msra.mxu0 %v596_v24 }
  0xfd   : > { %v447_v30 = vsel %vm445_vm12, %v442_v19, %v444_v26 }
  0xfe   : > { %451 = vst [vmem:[#allocation3] sm:$0xf0] %v447_v30 }
 0x102   : > { %v594_v33 = vld [vmem:[#allocation3 + $0x30] sm:$0xff] }
 0x105   : > { %v595_v31 = vld [vmem:[#allocation3] sm:$0xff] }
 0x106   : > { %651 = vmatprep.subr.mxu0 %v595_v31 }
 0x107   : > { %652 = vmatpush1.msra.mxu0 %v594_v33 }
 0x108   : > { %1261 = vmatmul.mubr.msk.f32.vlgmr.msra.gmra.mxu0 %vm610_vm13, %v593_v32 }
 0x109   : > { %1130 = vmatprep.mubr.f32.mxu0 %v1527_v0  ;;  %v608_v40 = vpop.permute.xlu0 %607 }
 0x14b   : > { %v796_v57 = vpop.permute.xlu0 %795 }
 0x14e   : > { %v858_v59 = vpop.permute.xlu1 %857 }
 0x14f   : > { %v821_v58 = vpop.permute.xlu0 %820 }
 0x153   : > { %v841_v60 = vpop.permute.xlu0 %840 }
 0x1c8   : > { %v687_v41 = vpop.f32.mrf.mxu0 }
 0x1c9   : > { %v688_v42 = vadd.f32 %v687_v41, %v608_v40 }
 0x1ca   : > { %v689_v43 = vpop.f32.mrf.mxu0 }
 0x1cb   : > { %v690_v44 = vadd.f32 %v689_v43, %v608_v40  ;;  %v692_v45 = vmax.f32 %v688_v42, 0.0 }
 0x1cd   : > { %v693_v46 = vmax.f32 %v690_v44, 0.0  ;;  %v1373_v55 = vcombine.low %v692_v45, %v692_v45 }
 0x1cf   : > { %v696_v0 = vcombine.low %v692_v45, %v693_v46  ;;  %v1372_v47 = vcombine.low %v693_v46, %v693_v46 }
 0x1d1   : > { %698 = vst [vmem:[#allocation2 + $0x4] sm:$0xff] %v696_v0  ;;  %853 = vrot.lane.b32.xlu0 %v696_v0, %s1528_s15  ;;  %791 = vrot.lane.b32.xlu1 %v696_v0, %s1529_s17  ;;  %784 = vst [vmem:[#allocation3 + $0x48] sm:$0xf] %v696_v0 }
 0x1d2   : > { %785 = vst [vmem:[#allocation3 + $0x28] sm:$0xf] %v1372_v47 }
 0x1d5   : > { %816 = vrot.lane.b32.xlu0 %v696_v0, %s1531_s29  ;;  %838 = vrot.lane.b32.xlu1 %v696_v0, %s1530_s21 }
 0x1d8   : > { %v756_v48 = vld [vmem:[#allocation2 + $0x8] sm:$0xf]  ;;  %v736_v49 = vld [vmem:[#allocation2] sm:$0xff] }
 0x1d9   : > { %764 = vrot.lane.b32.xlu0 %v756_v48, %s1532_s14  ;;  %741 = vrot.lane.b32.xlu1 %v736_v49, %s1533_s18  ;;  %v700_v50 = vld [vmem:[#allocation2 + $0x8] sm:$0xf]  ;;  %v740_v52 = vcombine.high %v736_v49, %v736_v49  ;;  %v722_v56 = vcombine.low %v736_v49, %v736_v49 }
 0x1da   : > { %v737_v51 = vld [vmem:[#allocation2 + $0x8] sm:$0xf] }
 0x1db   : > { %v1363_v53 = vld [vmem:[#allocation2 + $0x8] ss:$0 sps:$4 sm:$0xff]  }
 0x1dd   : > { %760 = vrot.lane.b32.xlu0 %v736_v49, %s1532_s14  ;;  %708 = vrot.lane.b32.xlu1 %v700_v50, %s1534_s26 }
 0x1e1   : > { %745 = vrot.lane.b32.xlu0 %v737_v51, %s1533_s18  ;;  %726 = vrot.lane.b32.xlu1 %v736_v49, %s1535_s27 }
 0x1e5   : > { %855 = vrot.lane.b32.xlu1 %v1372_v47, %s1528_s15  ;;  %704 = vrot.lane.b32.xlu0 %v736_v49, %s1534_s26  ;;  %s1143_s15 = scalar_lea.sflag [#allocation6], %s1706_s6 }
 0x1e9   : > { %793 = vrot.lane.b32.xlu1 %v1372_v47, %s1529_s17  ;;  %706 = vrot.lane.b32.xlu0 %v740_v52, %s1534_s26  ;;  %s1454_s17 = scalar_lea.vmem %s1158_s24, 128 }
 0x1ea   : > { %p1455_p13 = scmp.ne.s32.totalorder %s1158_s24, %s1454_s17 }
 0x1ec   : > { %p1456_p1 = pnand %p1455_p13, %p2017_p0 }
 0x1ed   : > { %818 = vrot.lane.b32.xlu1 %v1372_v47, %s1531_s29  ;;  %728 = vrot.lane.b32.xlu0 %v1363_v53, %s1535_s27 }
 0x1ee   : > { %p1457_p2 = pneg %p1456_p1 }
 0x1f1   : > { %762 = vrot.lane.b32.xlu1 %v740_v52, %s1532_s14  ;;  %881 = vperm.xlu0 %1353, %v878_v54  }
 0x1f5   : > { %836 = vrot.lane.b32.xlu1 %v1373_v55, %s1530_s21  ;;  %s1537_s21 = smov [#allocation10]  }
 0x1f6   : > { %s1458_s13 = sshll.u32 %s1537_s21, 4  ;;  %s1459_s13 = int_to_ptr.vmem [resolvable:$false] %s1458_s13 }
 0x1f7   : > { %s1460_s7 = scalar_lea.vmem %s1459_s13, 256  ;;  %p1461_p4 = scmp.lt.s32.totalorder %s1158_s24, %s1459_s13 }
 0x1f8   : > { %p1462_p6 = scmp.lt.s32.totalorder %s1460_s7, %s1454_s17 }
 0x1f9   : > { %743 = vrot.lane.b32.xlu1 %v740_v52, %s1533_s18 }
 0x1fa   : > { %p1463_p8 = por %p1462_p6, %p1461_p4 }
 0x1fc   : > { %p1464_p12 = pnand %p1463_p8, %p1457_p2 }
 0x1fd   : > { %724 = vrot.lane.b32.xlu1 %v722_v56, %s1535_s27 }
 0x243   : > { %v792_v61 = vpop.permute.xlu1 %791  ;;  %v854_v62 = vpop.permute.xlu0 %853 }
 0x247   : > { %v839_v63 = vpop.permute.xlu1 %838  ;;  %v817_v2 = vpop.permute.xlu0 %816 }
 0x248   : > { %v843_v4 = vsel %vm566_vm7, %v839_v63, %v841_v60 }
 0x249   : > { %847 = vst [vmem:[#allocation3 + $0x20] sm:$0xf0] %v843_v4 }
 0x24b   : > { %v742_v5 = vpop.permute.xlu1 %741  ;;  %v765_v6 = vpop.permute.xlu0 %764 }
 0x24f   : > { %v709_v7 = vpop.permute.xlu1 %708  ;;  %v761_v8 = vpop.permute.xlu0 %760 }
 0x253   : > { %v1860_v9 = vpop.permute.xlu1 %726  ;;  %v746_v10 = vpop.permute.xlu0 %745 }
 0x257   : > { %v856_v11 = vpop.permute.xlu1 %855  ;;  %v705_v12 = vpop.permute.xlu0 %704 }
 0x258   : > { %v859_v13 = vsel %vm584_vm3, %v854_v62, %v856_v11  ;;  %v860_v14 = vsel %vm584_vm3, %v856_v11, %v858_v59 }
 0x259   : > { %v863_v15 = vsel %vm1769_vm1, %v859_v13, 0.0  ;;  %v864_v16 = vsel %vm1773_vm2, %v860_v14, 0.0 }
 0x25a   : > { %865 = vst [vmem:[#allocation3 + $0x40] sm:$0xf] %v863_v15  ;;  %866 = vst [vmem:[#allocation3 + $0x38] sm:$0xf] %v864_v16 }
 0x25b   : > { %v794_v17 = vpop.permute.xlu1 %793  ;;  %v707_v18 = vpop.permute.xlu0 %706 }
 0x25c   : > { %v797_v19 = vsel %vm519_vm0, %v792_v61, %v794_v17  ;;  %v798_v20 = vsel %vm519_vm0, %v794_v17, %v796_v57  ;;  %v710_v21 = vsel %vm424_vm11, %v705_v12, %v707_v18  ;;  %v711_v22 = vsel %vm424_vm11, %v707_v18, %v709_v7 }
 0x25d   : > { %v801_v23 = vsel %vm1769_vm1, %v797_v19, 0.0  ;;  %v802_v24 = vsel %vm1773_vm2, %v798_v20, 0.0  ;;  %v714_v25 = vsel %vm1783_vm5, %v710_v21, 0.0  ;;  %v715_v26 = vsel %vm1787_vm6, %v711_v22, 0.0 }
 0x25e   : > { %v805_v27 = vrot.slane %v801_v23, 4  ;;  %v806_v30 = vrot.slane %v802_v24, 4  ;;  %716 = vst [vmem:[#allocation3 + $0x30] sm:$0xf] %v714_v25  ;;  %717 = vst [vmem:[#allocation3] sm:$0xf] %v715_v26 }
 0x25f   : > { %v819_v31 = vpop.permute.xlu1 %818  ;;  %v729_v32 = vpop.permute.xlu0 %728 }
 0x260   : > { %809 = vst [vmem:[#allocation3 + $0x48] sm:$0xf0] %v805_v27  ;;  %810 = vst [vmem:[#allocation3 + $0x28] sm:$0xf0] %v806_v30  ;;  %v822_v33 = vsel %vm545_vm4, %v817_v2, %v819_v31  ;;  %v823_v34 = vsel %vm545_vm4, %v819_v31, %v821_v58  ;;  %v731_v35 = vsel %vm445_vm12, %v1860_v9, %v729_v32 }
 0x261   : > { %v826_v36 = vsel %vm1783_vm5, %v822_v33, 0.0  ;;  %v827_v37 = vsel %vm1787_vm6, %v823_v34, 0.0  ;;  %735 = vst [vmem:[#allocation3] sm:$0xf0] %v731_v35  ;;  %v877_v40 = vld [vmem:[#allocation3 + $0x38] sm:$0xf] }
 0x262   : > { %v876_v41 = vld [vmem:[#allocation3 + $0x40] sm:$0xf]  ;;  %828 = vst [vmem:[#allocation3 + $0x8] sm:$0xf] %v826_v36  ;;  %829 = vst [vmem:[#allocation3 + $0x20] sm:$0xf] %v827_v37  ;;  %1262 = vmatprep.subr.msk.mxu1 %vm614_vm9, %v877_v40 }
 0x263   : > { %v763_v42 = vpop.permute.xlu1 %762  ;;  %1263 = vmatpush1.msk.msra.mxu1 %vm614_vm9, %v876_v41 }
 0x264   : > { %v766_v43 = vsel %vm487_vm8, %v761_v8, %v763_v42  ;;  %v767_v44 = vsel %vm487_vm8, %v763_v42, %v765_v6 }
 0x265   : > { %v770_v45 = vsel %vm1783_vm5, %v766_v43, 0.0  ;;  %v771_v46 = vsel %vm1787_vm6, %v767_v44, 0.0  ;;  %v1015_v43 = vld [vmem:[#allocation7] sm:$0xff] }
 0x266   : > { %v774_v0 = vrot.slane %v770_v45, 4  ;;  %v775_v47 = vrot.slane %v771_v46, 4 }
 0x267   : > { %v837_v48 = vpop.permute.xlu1 %836  ;;  %v873_v57 = vld [vmem:[#allocation3 + $0x28] sm:$0xff] }
 0x268   : > { %778 = vst [vmem:[#allocation3 + $0x18] sm:$0xf0] %v774_v0  ;;  %779 = vst [vmem:[#allocation3 + $0x10] sm:$0xf0] %v775_v47  ;;  %v842_v49 = vsel %vm566_vm7, %v837_v48, %v839_v63  ;;  %v872_v58 = vld [vmem:[#allocation3 + $0x48] sm:$0xff]  ;;  %v869_v28 = vld [vmem:[#allocation3] sm:$0xff]  ;;  %v1019_v48 = vcombine.high %v1015_v43, %v1015_v43 }
 0x269   : > { %846 = vst [vmem:[#allocation3 + $0x8] sm:$0xf0] %v842_v49  ;;  %v875_v50 = vld [vmem:[#allocation3 + $0x20] sm:$0xff]  ;;  %v1016_v47 = vld [vmem:[#allocation7 + $0x8] sm:$0xff] }
 0x26a   : > { %917 = vmatprep.subr.mxu1 %v875_v50 }
 0x26b   : > { %v744_v51 = vpop.permute.xlu1 %743 }
 0x26c   : > { %v747_v52 = vsel %vm467_vm10, %v742_v5, %v744_v51  ;;  %v748_v53 = vsel %vm467_vm10, %v744_v51, %v746_v10  ;;  %v882_v62 = vpop.permute.xlu0 %881  ;;  %v972_v10 = vld [vmem:[%s1982_s5 + $0x8] sm:$0xff] }
 0x26d   : > { %v751_v38 = vsel %vm1769_vm1, %v747_v52, 0.0  ;;  %v752_v39 = vsel %vm1773_vm2, %v748_v53, 0.0  ;;  %v976_v12 = vcombine.high %v972_v10, %v972_v10  ;;  %v1020_v53 = vcombine.high %v1016_v47, %v1016_v47 }
 0x26e   : > { %753 = vst [vmem:[#allocation3 + $0x18] sm:$0xf] %v751_v38  ;;  %754 = vst [vmem:[#allocation3 + $0x10] sm:$0xf] %v752_v39 }
 0x26f   : > { %v725_v54 = vpop.permute.xlu1 %724 }
 0x270   : > { %v730_v55 = vsel %vm445_vm12, %v725_v54, %v1860_v9  ;;  %v874_v56 = vld [vmem:[#allocation3 + $0x8] sm:$0xff]  ;;  %v971_v9 = vld [vmem:[%s1982_s5] sm:$0xff] }
 0x271   : > { %734 = vst [vmem:[#allocation3 + $0x30] sm:$0xf0] %v730_v55  ;;  %918 = vmatpush1.msra.mxu1 %v874_v56  ;;  %v975_v11 = vcombine.high %v971_v9, %v971_v9 }
 0x272   : > { %919 = vmatprep.subr.mxu1 %v873_v57 }
 0x273   : > { %920 = vmatpush1.msra.mxu1 %v872_v58 }
 0x275   : > { %v871_v59 = vld [vmem:[#allocation3 + $0x10] sm:$0xff]  ;;  %v870_v60 = vld [vmem:[#allocation3 + $0x18] sm:$0xff] }
 0x276   : > { %921 = vmatprep.subr.mxu1 %v871_v59 }
 0x277   : > { %922 = vmatpush1.msra.mxu1 %v870_v60 }
 0x278   : > { %923 = vmatprep.subr.mxu1 %v869_v28  ;;  %v868_v61 = vld [vmem:[#allocation3 + $0x30] sm:$0xff] }
 0x279   : > { %924 = vmatpush1.msra.mxu1 %v868_v61 }
 0x27a   : > { %1264 = vmatmul.mubr.msk.f32.vlgmr.msra.gmra.mxu1 %vm610_vm13, %v867_v29 }
 0x33a   : > { %v959_v63 = vpop.f32.mrf.mxu1 }
 0x33b   : > { %v1909_v2 = vadd.f32 %v959_v63, %v882_v62 }
 0x33c   : > { %v961_v4 = vpop.f32.mrf.mxu1 }
 0x33d   : > { %v1911_v5 = vadd.f32 %v961_v4, %v882_v62  ;;  %v964_v6 = vsel %vm614_vm9, %v1909_v2, 0.0 }
 0x33f   : > { %v965_v7 = vsel %vm614_vm9, %v1911_v5, 0.0 }
 0x340   : > { %v966_v8 = vadd.f32 %v965_v7, %v964_v6  ;;  %v1050_v6 = vld [vmem:[%s1985_s8] sm:$0xf] }
 0x342   : > { %967 = vadd.xlane.f32.xlu1 %v966_v8 }
 0x3cb   : > { %v968_v13 = vpop.xlane.xlu1 %967 }
 0x3cc   : > { %v970_v14 = vmul.f32 0.00390625, %v968_v13 }
 0x3ce   : > { %v979_v15 = vmul.f32 %v971_v9, %v970_v14  ;;  %v980_v16 = vmul.f32 %v975_v11, %v970_v14  ;;  %v981_v17 = vmul.f32 %v972_v10, %v970_v14  ;;  %v982_v18 = vmul.f32 %v976_v12, %v970_v14 }
 0x3d0   : > { %v983_v19 = vsel %vm614_vm9, %v979_v15, 0.0  ;;  %v990_v20 = vsel %vm614_vm9, %v980_v16, 0.0  ;;  %v997_v21 = vsel %vm614_vm9, %v981_v17, 0.0  ;;  %v1004_v22 = vsel %vm614_vm9, %v982_v18, 0.0  ;;  %v1049_v16 = vld [vmem:[#allocation9] sm:$0xf] }
 0x3d1   : > { %v984_v23 = vrot.slane %v983_v19, 4  ;;  %v991_v24 = vrot.slane %v990_v20, 4  ;;  %v998_v25 = vrot.slane %v997_v21, 4  ;;  %v1005_v26 = vrot.slane %v1004_v22, 4 }
 0x3d3   : > { %v985_v27 = vadd.f32 %v984_v23, %v983_v19  ;;  %v992_v30 = vadd.f32 %v991_v24, %v990_v20  ;;  %v999_v31 = vadd.f32 %v998_v25, %v997_v21  ;;  %v1006_v32 = vadd.f32 %v1005_v26, %v1004_v22 }
 0x3d5   : > { %v986_v33 = vrot.slane %v985_v27, 2  ;;  %v993_v34 = vrot.slane %v992_v30, 2  ;;  %v1000_v35 = vrot.slane %v999_v31, 2  ;;  %v1007_v36 = vrot.slane %v1006_v32, 2 }
 0x3d7   : > { %v987_v37 = vadd.f32 %v986_v33, %v985_v27  ;;  %v994_v40 = vadd.f32 %v993_v34, %v992_v30  ;;  %v1001_v41 = vadd.f32 %v1000_v35, %v999_v31  ;;  %v1008_v42 = vadd.f32 %v1007_v36, %v1006_v32 }
 0x3d9   : > { %v988_v44 = vrot.slane %v987_v37, 1  ;;  %v995_v45 = vrot.slane %v994_v40, 1  ;;  %v1002_v46 = vrot.slane %v1001_v41, 1  ;;  %v1009_v0 = vrot.slane %v1008_v42, 1 }
 0x3db   : > { %v989_v49 = vadd.f32 %v988_v44, %v987_v37  ;;  %v996_v50 = vadd.f32 %v995_v45, %v994_v40  ;;  %v1003_v51 = vadd.f32 %v1002_v46, %v1001_v41  ;;  %v1010_v52 = vadd.f32 %v1009_v0, %v1008_v42 }
 0x3dd   : > { %v1011_v38 = vmax.f32 %v989_v49, 0.0  ;;  %v1012_v39 = vmax.f32 %v996_v50, 0.0  ;;  %v1013_v54 = vmax.f32 %v1003_v51, 0.0  ;;  %v1014_v55 = vmax.f32 %v1010_v52, 0.0 }
 0x3df   : > { %v1023_v56 = vmul.f32 %v1015_v43, %v1011_v38  ;;  %v1024_v57 = vmul.f32 %v1019_v48, %v1012_v39  ;;  %v1025_v58 = vmul.f32 %v1016_v47, %v1013_v54  ;;  %v1026_v59 = vmul.f32 %v1020_v53, %v1014_v55 }
 0x3e1   : > { %v1027_v60 = vsel %vm614_vm9, %v1023_v56, 0.0  ;;  %v1028_v28 = vsel %vm614_vm9, %v1024_v57, 0.0  ;;  %v1030_v61 = vsel %vm614_vm9, %v1025_v58, 0.0  ;;  %v1032_v63 = vsel %vm614_vm9, %v1026_v59, 0.0 }
 0x3e2   : > { %v1029_v29 = vadd.f32 %v1028_v28, %v1027_v60 }
 0x3e4   : > { %v1031_v62 = vadd.f32 %v1030_v61, %v1029_v29 }
 0x3e6   : > { %v1033_v4 = vadd.f32 %v1032_v63, %v1031_v62 }
 0x3e8   : > { %1034 = vadd.xlane.f32.xlu0 %v1033_v4 }
 0x3fe   : > { %1053 = vperm.xlu0 %1353, %v1050_v6  }
 0x471   : > { %v1035_v7 = vpop.xlane.xlu0 %1034 }
 0x472   : > { %v1265_v8 = vmul.f32 -1.442695, %v1035_v7 }
 0x474   : > { %1368 = vpow2.f32 %v1265_v8 }
 0x479   : > { %v1054_v18 = vpop.permute.xlu0 %1053 }
 0x481   : > { %v1369_v9 = vpop.eup %1368 }
 0x482   : > { %v1039_v10 = vadd.f32 1.0, %v1369_v9 }
 0x484   : > { %1370 = vrcp.f32 %v1039_v10 }
 0x491   : > { %v1371_v11 = vpop.eup %1370 }
 0x492   : > { %v1043_v12 = vmul.f32 %v1371_v11, %v1911_v5  ;;  %v1042_v13 = vmul.f32 %v1371_v11, %v1909_v2 }
 0x494   : > { %v1048_v14 = vadd.f32 %v1043_v12, %v1731_v3  ;;  %v1047_v15 = vadd.f32 %v1042_v13, %v1724_v1 }
 0x496   : > { %1266 = vmatprep.subr.msk.mxu0 %vm614_vm9, %v1048_v14 }
 0x497   : > { %1267 = vmatpush1.msk.msra.mxu0 %vm614_vm9, %v1047_v15 }
 0x498   : > { %1268 = vmatmul.mubr.msk.f32.vlgmr.msra.gmra.mxu0 %vm1056_vm14, %v1049_v16 }
 0x558   : > { %v1132_v17 = vpop.f32.mrf.mxu0 }
 0x559   : > { %v1133_v2 = vadd.f32 %v1132_v17, %v1054_v18 }
 0x55a   : > { %v1134_v19 = vpop.f32.mrf.mxu0 }
 0x55b   : > { %v1135_v3 = vadd.f32 %v1134_v19, %v1054_v18 }
 0x55d   : > { %v1139_v5 = vcombine.low %v1133_v2, %v1135_v3 }
 0x55f   : > { %1141 = vst [vmem:[%s373_s25] sm:$0xff] %v1139_v5 }
 0x560   : > { %1467 = shalt.err (!%p1464_p12)
}
 0x561   : > { %s1468_s29 = scalar_lea.hbm %s1155_s11, 128  ;;  %s1472_s18 = scalar_lea.hbm %s1986_s9, 256 }
 0x562   : > { %p1469_p3 = scmp.ne.s32.totalorder %s1155_s11, %s1468_s29  ;;  %p1473_p5 = scmp.lt.s32.totalorder %s1155_s11, %s1986_s9 }
 0x563   : > { %p1474_p9 = scmp.lt.s32.totalorder %s1472_s18, %s1468_s29 }
 0x564   : > { %p1470_p7 = pnand %p1469_p3, %p2017_p0 }
 0x565   : > { %p1475_p11 = por %p1474_p9, %p1473_p5 }
 0x566   : > { %p1471_p10 = pneg %p1470_p7 }
 0x568   : > { %p1476_p13 = pnand %p1475_p11, %p1471_p10 }
 0x56a   : > { %1479 = shalt.err (!%p1476_p13)
}
 0x56b   : > { %1286 = dma.vmem_to_hbm [thread:$0]  (%p2017_p0), %s1158_s24, 128, %s1155_s11, %s1143_s15  }
 0x56c PF: > { %s1169_s28 = sand.u32 1, %s1510_s30   ;;  %p2018_p1 = scmp.ne.s32.totalorder %s1996_s16, 0 }
 0x56d   : > { %p2019_p2 = scmp.ge.s32.totalorder %s1522_s12, 2  ;;  %s1170_s25 = scalar_lea.sflag [#allocation6], %s1169_s28 }
 0x56f   : > { %p1300_p4 = pnand %p2019_p2, %p2018_p1 }
 0x571   : > { %p1301_p6 = pneg %p1300_p4 }
 0x573   : > { %1505 = dma.done.wait (%p1301_p6), %s1170_s25, 128  }
 0x574   : > { %1507 = vsyncadd (%p1301_p6), %s1170_s25, 4294967168  ;;  %s2020_s22 = sld [smem:[#allocation14_spill]]  ;;  %p23_p8 = scmp.ge.s32.totalorder %s1642_s23, 4  }
 0x575   : > { %s2021_s11 = sld [smem:[#allocation15_spill]]  ;;  %s2022_s30 = smov %s1514_s10 }
 0x576   : > { %s2024_s12 = smov %s1642_s23  ;;  %25 = sbr.rel (!%p23_p8) target bundleno = 9 (0x9), region = 109 }
 0x57a   : > { %s2023_s10 = smov %s2020_s22 }
 0x57b   :  { %1175 = vsyncpa [#allocation5], 1 }
 0x57c   :  { %1177 = vsyncpa [#allocation5 + $0x1], 1 }
 0x57d   :  { %1178 = vsyncpa [#allocation8], 1 }
 0x57e   :  { %1179 = vsyncpa [#allocation6], 1 }
 0x57f   :  { %1181 = vsyncpa [#allocation6 + $0x1], 1 }

</bundles_post_ra>
